<compile_context>
chip_gen: v7x
topology: tpu7x:2x2x1
jax: 0.10.0
libtpu: 0.0.40
codegen_flags: <defaults>
</compile_context>

<pallas_src>
import math

import jax
import jax.numpy as jnp
from jax.experimental import pallas as pl
from jax.experimental.pallas import tpu as pltpu


def _coupling_kernel(x_ref, mask_ref,
                     tw1_ref, tb1_ref, tw2_ref, tb2_ref, tw3_ref, tb3_ref,
                     sw1_ref, sb1_ref, sw2_ref, sb2_ref, sw3_ref, sb3_ref,
                     z_ref, logdet_ref):
    # x_ref:    (dim, tile_b)  -- batch on lanes
    # mask_ref: (dim, 1)       -- per-feature binary mask, broadcast over lanes
    # weights:  (out, in) PyTorch layout; biases: (out, 1)
    x = x_ref[...]                                   # (dim, tb) f32
    mask = mask_ref[...]                             # (dim, 1)
    keeped = x * mask                                # (dim, tb)

    def mlp(w1, b1, w2, b2, w3, b3):
        # h = tanh(W1 @ x + b1); h = tanh(W2 @ h + b2); y = W3 @ h + b3
        h = jnp.tanh(
            jnp.dot(w1[...], keeped, preferred_element_type=jnp.float32)
            + b1[...])                               # (hid, tb)
        h = jnp.tanh(
            jnp.dot(w2[...], h, preferred_element_type=jnp.float32)
            + b2[...])                               # (hid, tb)
        return (jnp.dot(w3[...], h, preferred_element_type=jnp.float32)
                + b3[...])                           # (dim, tb)

    t1 = mlp(tw1_ref, tb1_ref, tw2_ref, tb2_ref, tw3_ref, tb3_ref)
    s1 = jnp.tanh(mlp(sw1_ref, sb1_ref, sw2_ref, sb2_ref, sw3_ref, sb3_ref))

    inv_mask = 1.0 - mask                            # (dim, 1)
    z = keeped + inv_mask * (x - t1) * jnp.exp(-s1)  # (dim, tb)
    z_ref[...] = z.astype(z_ref.dtype)

    log_det = jnp.sum(inv_mask * (-s1), axis=0, keepdims=True)   # (1, tb)
    logdet_ref[...] = log_det.astype(logdet_ref.dtype)


def coupling_forward(x, mask, t_params, s_params, *, tile_b=None):
    """RealNVP coupling-layer forward.

    Args:
      x:        (B, dim) float32 input (PyTorch layout).
      mask:     (dim,) binary mask.
      t_params: tuple (W1,b1,W2,b2,W3,b3) for the translate net,
                W in (out,in) PyTorch layout, b in (out,1).
      s_params: same for the scale net.
      tile_b:   optional batch tile (multiple of 128) for very large batches;
                by default the whole batch is one grid step.

    Returns: (z of shape (B, dim), log_det of shape (B,))
    """
    B, dim = x.shape

    if tile_b is None or tile_b >= B:
        tile_b = B                      # single fat grid step: no per-step overhead
    else:
        assert B % tile_b == 0, "batch must be divisible by tile_b"
        assert tile_b % 128 == 0, "tile_b must be lane-aligned (multiple of 128)"
    grid = (B // tile_b,)

    # Batch on lanes.
    xT = x.T                            # (dim, B)
    mask2d = mask.reshape(dim, 1).astype(x.dtype)

    def const_spec(shape):
        # Grid-invariant operand: same (0, 0) block every step.
        return pl.BlockSpec(shape, lambda i: (0, 0))

    params = tuple(t_params) + tuple(s_params)

    in_specs = [
        pl.BlockSpec((dim, tile_b), lambda i: (0, i)),   # xT tile (lane-dense)
        const_spec((dim, 1)),                            # mask
    ] + [const_spec(p.shape) for p in params]            # 12 weight/bias blocks

    out_specs = [
        pl.BlockSpec((dim, tile_b), lambda i: (0, i)),   # z  (lane-dense store)
        pl.BlockSpec((1, tile_b), lambda i: (0, i)),     # log_det
    ]

    zT, log_detT = pl.pallas_call(
        _coupling_kernel,
        out_shape=(
            jax.ShapeDtypeStruct((dim, B), x.dtype),
            jax.ShapeDtypeStruct((1, B), jnp.float32),
        ),
        grid_spec=pltpu.PrefetchScalarGridSpec(
            num_scalar_prefetch=0,
            grid=grid,
            in_specs=in_specs,
            out_specs=out_specs,
        ),
        compiler_params=pltpu.CompilerParams(
            # Batch axis is independent work -> shards across TCs on v7x when
            # the grid has multiple steps.
            dimension_semantics=("parallel",),
        ),
    )(xT, mask2d, *params)

    return zT.T, log_detT[0]


# ----------------------------------------------------------------------------
# Parameter init matching the PyTorch module (xavier_uniform_ weights, default
# nn.Linear bias init U(-1/sqrt(fan_in), 1/sqrt(fan_in))).  Weights are kept in
# the native PyTorch (out_features, in_features) layout; biases as (out, 1).
# ----------------------------------------------------------------------------
def init_base_params(key, in_dim, out_dim, hidden_dim):
    def xavier(k, fan_out, fan_in):
        bound = math.sqrt(6.0 / (fan_in + fan_out))
        return jax.random.uniform(k, (fan_out, fan_in), jnp.float32, -bound, bound)

    def bias(k, fan_in, fan_out):
        bound = 1.0 / math.sqrt(fan_in)
        return jax.random.uniform(k, (fan_out, 1), jnp.float32, -bound, bound)

    ks = jax.random.split(key, 6)
    w1 = xavier(ks[0], hidden_dim, in_dim)
    b1 = bias(ks[1], in_dim, hidden_dim)
    w2 = xavier(ks[2], hidden_dim, hidden_dim)
    b2 = bias(ks[3], hidden_dim, hidden_dim)
    w3 = xavier(ks[4], out_dim, hidden_dim)
    b3 = bias(ks[5], hidden_dim, out_dim)
    return (w1, b1, w2, b2, w3, b3)


# ----------------------------------------------------------------------------
# Pure-JAX reference (mirrors the PyTorch forward) for the self-test.
# ----------------------------------------------------------------------------
def _base_model_ref(x, params):
    w1, b1, w2, b2, w3, b3 = params
    h = jnp.tanh(x @ w1.T + b1[:, 0])
    h = jnp.tanh(h @ w2.T + b2[:, 0])
    return h @ w3.T + b3[:, 0]


def coupling_ref(x, mask, t_params, s_params):
    keeped = x * mask
    t1 = _base_model_ref(keeped, t_params)
    s1 = jnp.tanh(_base_model_ref(keeped, s_params))
    z = keeped + (1.0 - mask) * (x - t1) * jnp.exp(-s1)
    log_det = jnp.sum((1.0 - mask) * (-s1), axis=1)
    return z, log_det


if __name__ == "__main__":
    key = jax.random.PRNGKey(0)
    k_t, k_s, k_x = jax.random.split(key, 3)

    dim, hidden_dim = 4, 32          # Coupling_layer defaults
    batch = 256                      # small, lane-aligned batch

    mask = jnp.array([1.0, 0.0, 1.0, 0.0], jnp.float32)
    t_params = init_base_params(k_t, dim, dim, hidden_dim)
    s_params = init_base_params(k_s, dim, dim, hidden_dim)
    x = jax.random.normal(k_x, (batch, dim), jnp.float32)

    z, log_det = coupling_forward(x, mask, t_params, s_params)
    z = jax.block_until_ready(z)
    log_det = jax.block_until_ready(log_det)

    z_ref, log_det_ref = coupling_ref(x, mask, t_params, s_params)

    assert z.shape == (batch, dim)
    assert log_det.shape == (batch,)
    assert jnp.allclose(z, z_ref, atol=1e-5, rtol=1e-5), "z mismatch vs reference"
    assert jnp.allclose(log_det, log_det_ref, atol=1e-5, rtol=1e-5), "log_det mismatch"

    # TODO(synk): inverse() pass not implemented (only forward was requested).
    print("KERNEL_OK")
</pallas_src>

<mosaic_0001>
module attributes {stable_mosaic.version = 11 : i64} {
  func.func @_coupling_kernel(%arg0: i32, %arg1: memref<4x256xf32, #tpu.memory_space<vmem>>, %arg2: memref<4x1xf32, #tpu.memory_space<vmem>>, %arg3: memref<32x4xf32, #tpu.memory_space<vmem>>, %arg4: memref<32x1xf32, #tpu.memory_space<vmem>>, %arg5: memref<32x32xf32, #tpu.memory_space<vmem>>, %arg6: memref<32x1xf32, #tpu.memory_space<vmem>>, %arg7: memref<4x32xf32, #tpu.memory_space<vmem>>, %arg8: memref<4x1xf32, #tpu.memory_space<vmem>>, %arg9: memref<32x4xf32, #tpu.memory_space<vmem>>, %arg10: memref<32x1xf32, #tpu.memory_space<vmem>>, %arg11: memref<32x32xf32, #tpu.memory_space<vmem>>, %arg12: memref<32x1xf32, #tpu.memory_space<vmem>>, %arg13: memref<4x32xf32, #tpu.memory_space<vmem>>, %arg14: memref<4x1xf32, #tpu.memory_space<vmem>>, %arg15: memref<4x256xf32, #tpu.memory_space<vmem>>, %arg16: memref<1x256xf32, #tpu.memory_space<vmem>>) attributes {dimension_semantics = [#tpu.dimension_semantics<parallel>], iteration_bounds = array<i64: 1>, scalar_prefetch = 0 : i64, scratch_operands = 0 : i64, tpu.core_type = #tpu.core_type<tc>, window_params = [{transform_indices = @transform_0, window_bounds = array<i64: 4, 256>}, {pipeline_mode = #tpu.pipeline_mode<synchronous>, transform_indices = @transform_1, window_bounds = array<i64: 4, 1>}, {pipeline_mode = #tpu.pipeline_mode<synchronous>, transform_indices = @transform_2, window_bounds = array<i64: 32, 4>}, {pipeline_mode = #tpu.pipeline_mode<synchronous>, transform_indices = @transform_3, window_bounds = array<i64: 32, 1>}, {pipeline_mode = #tpu.pipeline_mode<synchronous>, transform_indices = @transform_4, window_bounds = array<i64: 32, 32>}, {pipeline_mode = #tpu.pipeline_mode<synchronous>, transform_indices = @transform_5, window_bounds = array<i64: 32, 1>}, {pipeline_mode = #tpu.pipeline_mode<synchronous>, transform_indices = @transform_6, window_bounds = array<i64: 4, 32>}, {pipeline_mode = #tpu.pipeline_mode<synchronous>, transform_indices = @transform_7, window_bounds = array<i64: 4, 1>}, {pipeline_mode = #tpu.pipeline_mode<synchronous>, transform_indices = @transform_8, window_bounds = array<i64: 32, 4>}, {pipeline_mode = #tpu.pipeline_mode<synchronous>, transform_indices = @transform_9, window_bounds = array<i64: 32, 1>}, {pipeline_mode = #tpu.pipeline_mode<synchronous>, transform_indices = @transform_10, window_bounds = array<i64: 32, 32>}, {pipeline_mode = #tpu.pipeline_mode<synchronous>, transform_indices = @transform_11, window_bounds = array<i64: 32, 1>}, {pipeline_mode = #tpu.pipeline_mode<synchronous>, transform_indices = @transform_12, window_bounds = array<i64: 4, 32>}, {pipeline_mode = #tpu.pipeline_mode<synchronous>, transform_indices = @transform_13, window_bounds = array<i64: 4, 1>}, {transform_indices = @transform_14, window_bounds = array<i64: 4, 256>}, {transform_indices = @transform_15, window_bounds = array<i64: 1, 256>}]} {
    %c0 = arith.constant 0 : index
    %c0_0 = arith.constant 0 : index
    %0 = vector.load %arg1[%c0, %c0_0] : memref<4x256xf32, #tpu.memory_space<vmem>>, vector<4x256xf32>
    %c0_1 = arith.constant 0 : index
    %c0_2 = arith.constant 0 : index
    %1 = vector.load %arg2[%c0_1, %c0_2] : memref<4x1xf32, #tpu.memory_space<vmem>>, vector<4x1xf32>
    %2 = vector.broadcast %1 : vector<4x1xf32> to vector<4x256xf32>
    %3 = arith.mulf %0, %2 : vector<4x256xf32>
    %c0_3 = arith.constant 0 : index
    %c0_4 = arith.constant 0 : index
    %4 = vector.load %arg3[%c0_3, %c0_4] : memref<32x4xf32, #tpu.memory_space<vmem>>, vector<32x4xf32>
    %cst = arith.constant dense<0.000000e+00> : vector<32x256xf32>
    %5 = tpu.matmul %4, %3, %cst {dimension_numbers = #tpu.dot_dimension_numbers<[1], [0], [0], [1], [0, 0, 1, 1], [], []>} : vector<32x4xf32>, vector<4x256xf32>, vector<32x256xf32> -> vector<32x256xf32>
    %c0_5 = arith.constant 0 : index
    %c0_6 = arith.constant 0 : index
    %6 = vector.load %arg4[%c0_5, %c0_6] : memref<32x1xf32, #tpu.memory_space<vmem>>, vector<32x1xf32>
    %7 = vector.broadcast %6 : vector<32x1xf32> to vector<32x256xf32>
    %8 = arith.addf %5, %7 : vector<32x256xf32>
    %9 = math.tanh %8 : vector<32x256xf32>
    %c0_7 = arith.constant 0 : index
    %c0_8 = arith.constant 0 : index
    %10 = vector.load %arg5[%c0_7, %c0_8] : memref<32x32xf32, #tpu.memory_space<vmem>>, vector<32x32xf32>
    %cst_9 = arith.constant dense<0.000000e+00> : vector<32x256xf32>
    %11 = tpu.matmul %10, %9, %cst_9 {dimension_numbers = #tpu.dot_dimension_numbers<[1], [0], [0], [1], [0, 0, 1, 1], [], []>} : vector<32x32xf32>, vector<32x256xf32>, vector<32x256xf32> -> vector<32x256xf32>
    %c0_10 = arith.constant 0 : index
    %c0_11 = arith.constant 0 : index
    %12 = vector.load %arg6[%c0_10, %c0_11] : memref<32x1xf32, #tpu.memory_space<vmem>>, vector<32x1xf32>
    %13 = vector.broadcast %12 : vector<32x1xf32> to vector<32x256xf32>
    %14 = arith.addf %11, %13 : vector<32x256xf32>
    %15 = math.tanh %14 : vector<32x256xf32>
    %c0_12 = arith.constant 0 : index
    %c0_13 = arith.constant 0 : index
    %16 = vector.load %arg7[%c0_12, %c0_13] : memref<4x32xf32, #tpu.memory_space<vmem>>, vector<4x32xf32>
    %cst_14 = arith.constant dense<0.000000e+00> : vector<4x256xf32>
    %17 = tpu.matmul %16, %15, %cst_14 {dimension_numbers = #tpu.dot_dimension_numbers<[1], [0], [0], [1], [0, 0, 1, 1], [], []>} : vector<4x32xf32>, vector<32x256xf32>, vector<4x256xf32> -> vector<4x256xf32>
    %c0_15 = arith.constant 0 : index
    %c0_16 = arith.constant 0 : index
    %18 = vector.load %arg8[%c0_15, %c0_16] : memref<4x1xf32, #tpu.memory_space<vmem>>, vector<4x1xf32>
    %19 = vector.broadcast %18 : vector<4x1xf32> to vector<4x256xf32>
    %20 = arith.addf %17, %19 : vector<4x256xf32>
    %c0_17 = arith.constant 0 : index
    %c0_18 = arith.constant 0 : index
    %21 = vector.load %arg9[%c0_17, %c0_18] : memref<32x4xf32, #tpu.memory_space<vmem>>, vector<32x4xf32>
    %cst_19 = arith.constant dense<0.000000e+00> : vector<32x256xf32>
    %22 = tpu.matmul %21, %3, %cst_19 {dimension_numbers = #tpu.dot_dimension_numbers<[1], [0], [0], [1], [0, 0, 1, 1], [], []>} : vector<32x4xf32>, vector<4x256xf32>, vector<32x256xf32> -> vector<32x256xf32>
    %c0_20 = arith.constant 0 : index
    %c0_21 = arith.constant 0 : index
    %23 = vector.load %arg10[%c0_20, %c0_21] : memref<32x1xf32, #tpu.memory_space<vmem>>, vector<32x1xf32>
    %24 = vector.broadcast %23 : vector<32x1xf32> to vector<32x256xf32>
    %25 = arith.addf %22, %24 : vector<32x256xf32>
    %26 = math.tanh %25 : vector<32x256xf32>
    %c0_22 = arith.constant 0 : index
    %c0_23 = arith.constant 0 : index
    %27 = vector.load %arg11[%c0_22, %c0_23] : memref<32x32xf32, #tpu.memory_space<vmem>>, vector<32x32xf32>
    %cst_24 = arith.constant dense<0.000000e+00> : vector<32x256xf32>
    %28 = tpu.matmul %27, %26, %cst_24 {dimension_numbers = #tpu.dot_dimension_numbers<[1], [0], [0], [1], [0, 0, 1, 1], [], []>} : vector<32x32xf32>, vector<32x256xf32>, vector<32x256xf32> -> vector<32x256xf32>
    %c0_25 = arith.constant 0 : index
    %c0_26 = arith.constant 0 : index
    %29 = vector.load %arg12[%c0_25, %c0_26] : memref<32x1xf32, #tpu.memory_space<vmem>>, vector<32x1xf32>
    %30 = vector.broadcast %29 : vector<32x1xf32> to vector<32x256xf32>
    %31 = arith.addf %28, %30 : vector<32x256xf32>
    %32 = math.tanh %31 : vector<32x256xf32>
    %c0_27 = arith.constant 0 : index
    %c0_28 = arith.constant 0 : index
    %33 = vector.load %arg13[%c0_27, %c0_28] : memref<4x32xf32, #tpu.memory_space<vmem>>, vector<4x32xf32>
    %cst_29 = arith.constant dense<0.000000e+00> : vector<4x256xf32>
    %34 = tpu.matmul %33, %32, %cst_29 {dimension_numbers = #tpu.dot_dimension_numbers<[1], [0], [0], [1], [0, 0, 1, 1], [], []>} : vector<4x32xf32>, vector<32x256xf32>, vector<4x256xf32> -> vector<4x256xf32>
    %c0_30 = arith.constant 0 : index
    %c0_31 = arith.constant 0 : index
    %35 = vector.load %arg14[%c0_30, %c0_31] : memref<4x1xf32, #tpu.memory_space<vmem>>, vector<4x1xf32>
    %36 = vector.broadcast %35 : vector<4x1xf32> to vector<4x256xf32>
    %37 = arith.addf %34, %36 : vector<4x256xf32>
    %38 = math.tanh %37 : vector<4x256xf32>
    %cst_32 = arith.constant 1.000000e+00 : f32
    %39 = vector.broadcast %cst_32 : f32 to vector<4x1xf32>
    %40 = arith.subf %39, %1 : vector<4x1xf32>
    %41 = arith.subf %0, %20 : vector<4x256xf32>
    %42 = vector.broadcast %40 : vector<4x1xf32> to vector<4x256xf32>
    %43 = arith.mulf %42, %41 : vector<4x256xf32>
    %cst_33 = arith.constant 0.000000e+00 : f32
    %44 = vector.broadcast %cst_33 : f32 to vector<4x256xf32>
    %45 = arith.subf %44, %38 : vector<4x256xf32>
    %46 = math.exp %45 : vector<4x256xf32>
    %47 = arith.mulf %43, %46 : vector<4x256xf32>
    %48 = arith.addf %3, %47 : vector<4x256xf32>
    %c0_34 = arith.constant 0 : index
    %c0_35 = arith.constant 0 : index
    %49 = vector.load %arg15[%c0_34, %c0_35] : memref<4x256xf32, #tpu.memory_space<vmem>>, vector<4x256xf32>
    tpu.vector_store %arg15[%c0_34, %c0_35], %48 {strides = array<i32>} : memref<4x256xf32, #tpu.memory_space<vmem>>, vector<4x256xf32>,
    %cst_36 = arith.constant 0.000000e+00 : f32
    %50 = vector.broadcast %cst_36 : f32 to vector<4x256xf32>
    %51 = arith.subf %50, %38 : vector<4x256xf32>
    %52 = vector.broadcast %40 : vector<4x1xf32> to vector<4x256xf32>
    %53 = arith.mulf %52, %51 : vector<4x256xf32>
    %cst_37 = arith.constant dense<0.000000e+00> : vector<256xf32>
    %54 = vector.multi_reduction <add>, %53, %cst_37 [0] : vector<4x256xf32> to vector<256xf32>
    %55 = vector.shape_cast %54 : vector<256xf32> to vector<1x256xf32>
    %c0_38 = arith.constant 0 : index
    %c0_39 = arith.constant 0 : index
    %56 = vector.load %arg16[%c0_38, %c0_39] : memref<1x256xf32, #tpu.memory_space<vmem>>, vector<1x256xf32>
    tpu.vector_store %arg16[%c0_38, %c0_39], %55 {strides = array<i32>} : memref<1x256xf32, #tpu.memory_space<vmem>>, vector<1x256xf32>,
    return
  }
  func.func @transform_0(%arg0: i32) -> (i32, i32) {
    %c0_i32 = arith.constant 0 : i32
    %c0_i32_0 = arith.constant 0 : i32
    return %c0_i32, %arg0 : i32, i32
  }
  func.func @transform_1(%arg0: i32) -> (i32, i32) {
    %c0_i32 = arith.constant 0 : i32
    %c0_i32_0 = arith.constant 0 : i32
    %c0_i32_1 = arith.constant 0 : i32
    return %c0_i32, %c0_i32_0 : i32, i32
  }
  func.func @transform_2(%arg0: i32) -> (i32, i32) {
    %c0_i32 = arith.constant 0 : i32
    %c0_i32_0 = arith.constant 0 : i32
    %c0_i32_1 = arith.constant 0 : i32
    return %c0_i32, %c0_i32_0 : i32, i32
  }
  func.func @transform_3(%arg0: i32) -> (i32, i32) {
    %c0_i32 = arith.constant 0 : i32
    %c0_i32_0 = arith.constant 0 : i32
    %c0_i32_1 = arith.constant 0 : i32
    return %c0_i32, %c0_i32_0 : i32, i32
  }
  func.func @transform_4(%arg0: i32) -> (i32, i32) {
    %c0_i32 = arith.constant 0 : i32
    %c0_i32_0 = arith.constant 0 : i32
    %c0_i32_1 = arith.constant 0 : i32
    return %c0_i32, %c0_i32_0 : i32, i32
  }
  func.func @transform_5(%arg0: i32) -> (i32, i32) {
    %c0_i32 = arith.constant 0 : i32
    %c0_i32_0 = arith.constant 0 : i32
    %c0_i32_1 = arith.constant 0 : i32
    return %c0_i32, %c0_i32_0 : i32, i32
  }
  func.func @transform_6(%arg0: i32) -> (i32, i32) {
    %c0_i32 = arith.constant 0 : i32
    %c0_i32_0 = arith.constant 0 : i32
    %c0_i32_1 = arith.constant 0 : i32
    return %c0_i32, %c0_i32_0 : i32, i32
  }
  func.func @transform_7(%arg0: i32) -> (i32, i32) {
    %c0_i32 = arith.constant 0 : i32
    %c0_i32_0 = arith.constant 0 : i32
    %c0_i32_1 = arith.constant 0 : i32
    return %c0_i32, %c0_i32_0 : i32, i32
  }
  func.func @transform_8(%arg0: i32) -> (i32, i32) {
    %c0_i32 = arith.constant 0 : i32
    %c0_i32_0 = arith.constant 0 : i32
    %c0_i32_1 = arith.constant 0 : i32
    return %c0_i32, %c0_i32_0 : i32, i32
  }
  func.func @transform_9(%arg0: i32) -> (i32, i32) {
    %c0_i32 = arith.constant 0 : i32
    %c0_i32_0 = arith.constant 0 : i32
    %c0_i32_1 = arith.constant 0 : i32
    return %c0_i32, %c0_i32_0 : i32, i32
  }
  func.func @transform_10(%arg0: i32) -> (i32, i32) {
    %c0_i32 = arith.constant 0 : i32
    %c0_i32_0 = arith.constant 0 : i32
    %c0_i32_1 = arith.constant 0 : i32
    return %c0_i32, %c0_i32_0 : i32, i32
  }
  func.func @transform_11(%arg0: i32) -> (i32, i32) {
    %c0_i32 = arith.constant 0 : i32
    %c0_i32_0 = arith.constant 0 : i32
    %c0_i32_1 = arith.constant 0 : i32
    return %c0_i32, %c0_i32_0 : i32, i32
  }
  func.func @transform_12(%arg0: i32) -> (i32, i32) {
    %c0_i32 = arith.constant 0 : i32
    %c0_i32_0 = arith.constant 0 : i32
    %c0_i32_1 = arith.constant 0 : i32
    return %c0_i32, %c0_i32_0 : i32, i32
  }
  func.func @transform_13(%arg0: i32) -> (i32, i32) {
    %c0_i32 = arith.constant 0 : i32
    %c0_i32_0 = arith.constant 0 : i32
    %c0_i32_1 = arith.constant 0 : i32
    return %c0_i32, %c0_i32_0 : i32, i32
  }
  func.func @transform_14(%arg0: i32) -> (i32, i32) {
    %c0_i32 = arith.constant 0 : i32
    %c0_i32_0 = arith.constant 0 : i32
    return %c0_i32, %arg0 : i32, i32
  }
  func.func @transform_15(%arg0: i32) -> (i32, i32) {
    %c0_i32 = arith.constant 0 : i32
    %c0_i32_0 = arith.constant 0 : i32
    return %c0_i32, %arg0 : i32, i32
  }
}

</mosaic_0001>

<bundles_post_ra>
// kernel: tpu_custom_call.1
= control target key start
LH: loop header
LB: loop body
LE: loop exit
PB: predicated region body
PF: predicated region fallthrough
CT: control target
= control target key end

     0   :  { %21 = vsyncpa [#allocation3], 0  ;;  %v1066_v1 = vmov 0   ;;  %s1380_s0 = inlined_call_operand.vmem [shape: f32[4,256], index: 0, kind: input, shape index: {}]   ;;  %s1381_s1 = inlined_call_operand.vmem [shape: f32[4,1], index: 1, kind: input, shape index: {}]   ;;  %s1382_s2 = inlined_call_operand.vmem [shape: f32[32,4], index: 2, kind: input, shape index: {}]   ;;  %s1383_s3 = inlined_call_operand.vmem [shape: f32[32,1], index: 3, kind: input, shape index: {}]   ;;  %s1384_s4 = inlined_call_operand.vmem [shape: f32[32,32], index: 4, kind: input, shape index: {}]   ;;  %s1385_s5 = inlined_call_operand.vmem [shape: f32[32,1], index: 5, kind: input, shape index: {}]   ;;  %s1386_s6 = inlined_call_operand.vmem [shape: f32[4,32], index: 6, kind: input, shape index: {}]   ;;  %s1387_s7 = inlined_call_operand.vmem [shape: f32[4,1], index: 7, kind: input, shape index: {}]   ;;  %s1388_s8 = inlined_call_operand.vmem [shape: f32[32,4], index: 8, kind: input, shape index: {}]   ;;  %s1389_s9 = inlined_call_operand.vmem [shape: f32[32,1], index: 9, kind: input, shape index: {}]   ;;  %s1390_s10 = inlined_call_operand.vmem [shape: f32[32,32], index: 10, kind: input, shape index: {}]   ;;  %s1391_s11 = inlined_call_operand.vmem [shape: f32[32,1], index: 11, kind: input, shape index: {}]   ;;  %s1392_s12 = inlined_call_operand.vmem [shape: f32[4,32], index: 12, kind: input, shape index: {}]   ;;  %s1393_s13 = inlined_call_operand.vmem [shape: f32[4,1], index: 13, kind: input, shape index: {}]   ;;  %s1394_s14 = inlined_call_operand.hbm [shape: f32[4,256], index: 14, kind: output, shape index: {0}]   ;;  %s1395_s15 = inlined_call_operand.hbm [shape: f32[1,256], index: 15, kind: output, shape index: {1}]  }
   0x1   :  { %v52_v0 = vld [vmem:[%s1381_s1] sm:$0xf]  ;;  %944 = vset.pattern.permute.xlu0 %v1066_v1  ;;  %945 = vset.pattern.permute.xlu1 %v1066_v1 }
   0x2   :  { %55 = vperm.xlu0 %944, %v52_v0   ;;  %v70_v2 = vld [vmem:[%s1383_s3] sm:$0xff] }
   0x3   :  { %22 = vsyncpa [#allocation5], 0  ;;  %v73_v3 = vld [vmem:[%s1383_s3 + $0x18] sm:$0xff]  ;;  %v1067_v4 = vmov 0.0   ;;  %v216_v5 = vld [vmem:[%s1385_s5 + $0x8] sm:$0xff]  ;;  %v787_v11 = vsub.f32 1.0, %v52_v0  ;;  %v60_v24 = vlaneseq }
   0x4   :  { %178 = vmatprep.mubr.f32.mxu0 %v1067_v4  ;;  %316 = vmatprep.mubr.f32.mxu1 %v1067_v4  ;;  %v218_v6 = vld [vmem:[%s1385_s5 + $0x18] sm:$0xff]  ;;  %v435_v7 = vld [vmem:[%s1389_s9 + $0x8] sm:$0xff]  ;;  %v72_v13 = vld [vmem:[%s1383_s3 + $0x10] sm:$0xff]  ;;  %v1068_v22 = vmov 839922192   ;;  %vm109_vm0 = vcmask 1043456  }
   0x5   :  { %v437_v8 = vld [vmem:[%s1389_s9 + $0x18] sm:$0xff]  ;;  %v572_v9 = vld [vmem:[%s1391_s11 + $0x8] sm:$0xff]  ;;  %v215_v14 = vld [vmem:[%s1385_s5] sm:$0xff]  ;;  %v58_v23 = vunpack.c.l.s4 %v1068_v22  ;;  %v1212_v26 = vshrl.u32 %v60_v24, 7  ;;  %vm96_vm1 = vcmask 31744   ;;  %vm239_vm2 = vcmask 261120  }
   0x6   :  { %76 = vperm.xlu0 %944, %v70_v2   ;;  %v574_v10 = vld [vmem:[%s1391_s11 + $0x18] sm:$0xff]  ;;  %v71_v12 = vld [vmem:[%s1383_s3 + $0x8] sm:$0xff]  ;;  %v217_v15 = vld [vmem:[%s1385_s5 + $0x10] sm:$0xff]  ;;  %s1071_s26 = smov [#allocation4]   ;;  %vm1350_vm3 = vcmp.lt.s32.totalorder %v60_v24, 256 }
   0x7   :  { %81 = vperm.xlu1 %945, %v71_v12   ;;  %v434_v16 = vld [vmem:[%s1389_s9] sm:$0xff]  ;;  %v436_v17 = vld [vmem:[%s1389_s9 + $0x10] sm:$0xff]  ;;  %v59_v25 = vunpack.c.0.s8 %v58_v23  ;;  %v67_v34 = vld [vmem:[%s1382_s2 + $0x8] sm:$0xff]  ;;  %s872_s27 = sshll.u32 %s1071_s26, 4  ;;  %s873_s27 = int_to_ptr.vmem [resolvable:$true] %s872_s27 }
   0x8   :  { %v571_v18 = vld [vmem:[%s1391_s11] sm:$0xff]  ;;  %v573_v19 = vld [vmem:[%s1391_s11 + $0x10] sm:$0xff]  ;;  %v69_v36 = vld [vmem:[%s1382_s2 + $0x18] sm:$0xff] }
   0x9   :  { %v705_v20 = vld [vmem:[%s1393_s13] sm:$0xf]  ;;  %v62_v27 = vsub.s32 %v59_v25, %v1212_v26  ;;  %v68_v35 = vld [vmem:[%s1382_s2 + $0x10] sm:$0xff] }
   0xa   :  { %91 = vperm.xlu0 %944, %v73_v3   ;;  %v350_v21 = vld [vmem:[%s1387_s7] sm:$0xf] }
   0xb   :  { %86 = vperm.xlu1 %945, %v72_v13   ;;  %v1218_v29 = vld [vmem:[%s1380_s0] sm:$0xff] }
   0xc   :  { %v66_v33 = vld [vmem:[%s1382_s2] sm:$0xff] }
   0xe   :  { %226 = vperm.xlu0 %944, %v216_v5  }
   0xf   :  { %221 = vperm.xlu1 %945, %v215_v14  }
  0x12   :  { %236 = vperm.xlu0 %944, %v218_v6   ;;  %v211_v6 = vld [vmem:[%s1384_s4] sm:$0xff] }
  0x13   :  { %231 = vperm.xlu1 %945, %v217_v15  }
  0x16   :  { %445 = vperm.xlu0 %944, %v435_v7   ;;  %v212_v7 = vld [vmem:[%s1384_s4 + $0x8] sm:$0xff] }
  0x17   :  { %440 = vperm.xlu1 %945, %v434_v16  }
  0x1a   :  { %455 = vperm.xlu0 %944, %v437_v8   ;;  %v213_v8 = vld [vmem:[%s1384_s4 + $0x10] sm:$0xff] }
  0x1b   :  { %450 = vperm.xlu1 %945, %v436_v17  }
  0x1e   :  { %582 = vperm.xlu0 %944, %v572_v9   ;;  %v214_v9 = vld [vmem:[%s1384_s4 + $0x18] sm:$0xff] }
  0x1f   :  { %577 = vperm.xlu1 %945, %v571_v18  }
  0x22   :  { %592 = vperm.xlu0 %944, %v574_v10  }
  0x23   :  { %587 = vperm.xlu1 %945, %v573_v19  }
  0x26   :  { %795 = vperm.xlu0 %944, %v787_v11  }
  0x27   :  { %708 = vperm.xlu1 %945, %v705_v20  }
  0x2b   :  { %353 = vperm.xlu1 %945, %v350_v21  }
  0x81   :  { %v56_v28 = vpop.permute.xlu0 %55 }
  0x82   :  { %v63_v30 = vrot.slane %v56_v28, %v62_v27 }
  0x84   :  { %v1221_v31 = vmul.f32 %v63_v30, %v1218_v29 }
  0x85   :  { %v77_v37 = vpop.permute.xlu0 %76 }
  0x86   :  { %v1225_v32 = vcombine.high %v1221_v31, %v1221_v31  ;;  %v82_v41 = vpop.permute.xlu1 %81 }
  0x88   :  { %884 = vmatprep.subr.msk.mxu0 %vm109_vm0, %v1225_v32 }
  0x89   :  { %885 = vmatpush1.msk.msra.mxu0 %vm109_vm0, %v1221_v31  ;;  %v92_v52 = vpop.permute.xlu0 %91 }
  0x8a   :  { %886 = vmatmul.mubr.msk.f32.vlgmr.msra.gmra.mrb[0].mxu0 %vm96_vm1, %v66_v33  ;;  %v87_v47 = vpop.permute.xlu1 %86 }
  0x8b   :  { %184 = vmatprep.mubr.f32.mxu0 %v1067_v4 }
  0x8d   :  { %v227_v15 = vpop.permute.xlu0 %226 }
  0x8e   :  { %887 = vmatmul.mubr.msk.f32.gmra.mrb[2].mxu0 %vm96_vm1, %v67_v34  ;;  %v222_v10 = vpop.permute.xlu1 %221 }
  0x8f   :  { %190 = vmatprep.mubr.f32.mxu0 %v1067_v4 }
  0x91   :  { %v237_v27 = vpop.permute.xlu0 %236 }
  0x92   :  { %888 = vmatmul.mubr.msk.f32.gmra.mrb[4].mxu0 %vm96_vm1, %v68_v35  ;;  %v232_v20 = vpop.permute.xlu1 %231 }
  0x93   :  { %196 = vmatprep.mubr.f32.mxu0 %v1067_v4 }
  0x96   :  { %889 = vmatmul.mubr.msk.f32.gmra.mrb[6].mxu0 %vm96_vm1, %v69_v36 }
  0x97   :  { %423 = vmatprep.mubr.f32.mxu0 %v1067_v4 }
 0x15d   :  { %v180_v38 = vpop.f32.mrb[0].mxu0 }
 0x15e   :  { %v181_v39 = vadd.f32 %v180_v38, %v77_v37  ;;  %v182_v40 = vpop.f32.mrb[1].mxu0 }
 0x15f   :  { %v183_v42 = vadd.f32 %v182_v40, %v77_v37 }
 0x160   :  { %946 = vtanh.f32 %v181_v39 }
 0x161   :  { %v186_v43 = vpop.f32.mrb[2].mxu0  ;;  %948 = vtanh.f32 %v183_v42 }
 0x162   :  { %v187_v44 = vadd.f32 %v186_v43, %v82_v41  ;;  %v188_v45 = vpop.f32.mrb[3].mxu0 }
 0x163   :  { %v189_v46 = vadd.f32 %v188_v45, %v82_v41 }
 0x164   :  { %950 = vtanh.f32 %v187_v44 }
 0x165   :  { %952 = vtanh.f32 %v189_v46  ;;  %v192_v48 = vpop.f32.mrb[4].mxu0 }
 0x166   :  { %v193_v49 = vadd.f32 %v192_v48, %v87_v47  ;;  %v194_v50 = vpop.f32.mrb[5].mxu0  ;;  %v430_v48 = vld [vmem:[%s1388_s8] sm:$0xff] }
 0x167   :  { %v195_v51 = vadd.f32 %v194_v50, %v87_v47  ;;  %v349_v47 = vld [vmem:[%s1386_s6] sm:$0xf]  ;;  %v433_v50 = vld [vmem:[%s1388_s8 + $0x18] sm:$0xff] }
 0x168   :  { %954 = vtanh.f32 %v193_v49  ;;  %v431_v49 = vld [vmem:[%s1388_s8 + $0x8] sm:$0xff] }
 0x169   :  { %v198_v53 = vpop.f32.mrb[6].mxu0  ;;  %956 = vtanh.f32 %v195_v51  ;;  %v441_v51 = vpop.permute.xlu1 %440 }
 0x16a   :  { %v199_v54 = vadd.f32 %v198_v53, %v92_v52  ;;  %v200_v55 = vpop.f32.mrb[7].mxu0  ;;  %v947_v57 = vpop.eup %946 }
 0x16b   :  { %v201_v56 = vadd.f32 %v200_v55, %v92_v52  ;;  %v949_v58 = vpop.eup %948 }
 0x16c   :  { %958 = vtanh.f32 %v199_v54 }
 0x16d   :  { %960 = vtanh.f32 %v201_v56  ;;  %v451_v52 = vpop.permute.xlu1 %450 }
 0x16e   :  { %v951_v59 = vpop.eup %950 }
 0x16f   :  { %v953_v60 = vpop.eup %952  ;;  %v908_v61 = vpack.c.bf16 %v951_v59, %v947_v57 }
 0x170   :  { %v906_v62 = vpack.c.bf16 %v953_v60, %v949_v58 }
 0x171   :  { %v1300_v53 = vpop.permute.xlu1 %577 }
 0x172   :  { %907 = vmatprep.subr.bf16.mxu1 %v906_v62  ;;  %v955_v63 = vpop.eup %954 }
 0x173   :  { %909 = vmatpush1.bf16.msra.mxu1 %v908_v61  ;;  %v957_v0 = vpop.eup %956 }
 0x175   :  { %v1302_v54 = vpop.permute.xlu1 %587 }
 0x176   :  { %v959_v1 = vpop.eup %958 }
 0x177   :  { %v961_v2 = vpop.eup %960  ;;  %v912_v3 = vpack.c.bf16 %v959_v1, %v955_v63 }
 0x178   :  { %v910_v5 = vpack.c.bf16 %v961_v2, %v957_v0  ;;  %v446_v2 = vpop.permute.xlu0 %445 }
 0x179   :  { %v1304_v55 = vpop.permute.xlu1 %708 }
 0x17a   :  { %911 = vmatprep.subr.bf16.mxu1 %v910_v5 }
 0x17b   :  { %913 = vmatpush1.bf16.msra.mxu1 %v912_v3 }
 0x17d   :  { %v354_v56 = vpop.permute.xlu1 %353 }
 0x17e   :  { %890 = vmatmul.mubr.msk.f32.vlgmr.msra.gmra.mrb[0].mxu1 %vm239_vm2, %v211_v6 }
 0x17f   :  { %322 = vmatprep.mubr.f32.mxu1 %v1067_v4 }
 0x182   :  { %891 = vmatmul.mubr.msk.f32.gmra.mrb[2].mxu1 %vm239_vm2, %v212_v7 }
 0x183   :  { %328 = vmatprep.mubr.f32.mxu1 %v1067_v4 }
 0x186   :  { %892 = vmatmul.mubr.msk.f32.gmra.mrb[4].mxu1 %vm239_vm2, %v213_v8 }
 0x187   :  { %334 = vmatprep.mubr.f32.mxu1 %v1067_v4 }
 0x18a   :  { %893 = vmatmul.mubr.msk.f32.gmra.mrb[6].mxu1 %vm239_vm2, %v214_v9 }
 0x18b   :  { %671 = vmatprep.mubr.f32.mxu1 %v1067_v4 }
 0x251   :  { %v318_v11 = vpop.f32.mrb[0].mxu1 }
 0x252   :  { %v319_v12 = vadd.f32 %v318_v11, %v222_v10  ;;  %v320_v13 = vpop.f32.mrb[1].mxu1 }
 0x253   :  { %v321_v14 = vadd.f32 %v320_v13, %v222_v10 }
 0x254   :  { %962 = vtanh.f32 %v319_v12  ;;  %v456_v12 = vpop.permute.xlu0 %455 }
 0x255   :  { %v324_v16 = vpop.f32.mrb[2].mxu1  ;;  %964 = vtanh.f32 %v321_v14 }
 0x256   :  { %v325_v17 = vadd.f32 %v324_v16, %v227_v15  ;;  %v326_v18 = vpop.f32.mrb[3].mxu1 }
 0x257   :  { %v327_v19 = vadd.f32 %v326_v18, %v227_v15 }
 0x258   :  { %966 = vtanh.f32 %v325_v17 }
 0x259   :  { %968 = vtanh.f32 %v327_v19  ;;  %v330_v21 = vpop.f32.mrb[4].mxu1 }
 0x25a   :  { %v331_v22 = vadd.f32 %v330_v21, %v232_v20  ;;  %v332_v23 = vpop.f32.mrb[5].mxu1 }
 0x25b   :  { %v333_v25 = vadd.f32 %v332_v23, %v232_v20 }
 0x25c   :  { %970 = vtanh.f32 %v331_v22 }
 0x25d   :  { %v336_v28 = vpop.f32.mrb[6].mxu1  ;;  %972 = vtanh.f32 %v333_v25 }
 0x25e   :  { %v337_v30 = vadd.f32 %v336_v28, %v237_v27  ;;  %v338_v33 = vpop.f32.mrb[7].mxu1  ;;  %v963_v35 = vpop.eup %962 }
 0x25f   :  { %v339_v34 = vadd.f32 %v338_v33, %v237_v27  ;;  %v965_v36 = vpop.eup %964 }
 0x260   :  { %974 = vtanh.f32 %v337_v30 }
 0x261   :  { %976 = vtanh.f32 %v339_v34  ;;  %v567_v34 = vld [vmem:[%s1390_s10] sm:$0xff] }
 0x262   :  { %v967_v37 = vpop.eup %966 }
 0x263   :  { %v969_v38 = vpop.eup %968  ;;  %v916_v39 = vpack.c.bf16 %v967_v37, %v963_v35  ;;  %v568_v35 = vld [vmem:[%s1390_s10 + $0x8] sm:$0xff]  ;;  %v570_v37 = vld [vmem:[%s1390_s10 + $0x18] sm:$0xff] }
 0x264   :  { %v914_v40 = vpack.c.bf16 %v969_v38, %v965_v36  ;;  %v569_v36 = vld [vmem:[%s1390_s10 + $0x10] sm:$0xff] }
 0x266   :  { %915 = vmatprep.subr.bf16.mxu0 %v914_v40  ;;  %v971_v41 = vpop.eup %970 }
 0x267   :  { %917 = vmatpush1.bf16.msra.mxu0 %v916_v39  ;;  %v973_v42 = vpop.eup %972 }
 0x26a   :  { %v975_v43 = vpop.eup %974 }
 0x26b   :  { %v977_v44 = vpop.eup %976  ;;  %v920_v45 = vpack.c.bf16 %v975_v43, %v971_v41 }
 0x26c   :  { %v918_v46 = vpack.c.bf16 %v977_v44, %v973_v42  ;;  %v583_v42 = vpop.permute.xlu0 %582 }
 0x26e   :  { %919 = vmatprep.subr.bf16.mxu0 %v918_v46 }
 0x26f   :  { %921 = vmatpush1.bf16.msra.mxu0 %v920_v45 }
 0x270   :  { %895 = vmatprep.subr.msk.mxu0 %vm109_vm0, %v1225_v32  ;;  %v432_v32 = vld [vmem:[%s1388_s8 + $0x10] sm:$0xff] }
 0x272   :  { %894 = vmatmul.mubr.msk.f32.vlgmr.msra.gmra.mrb[8].mxu0 %vm239_vm2, %v349_v47 }
 0x273   :  { %896 = vmatpush1.msk.msra.mxu0 %vm109_vm0, %v1221_v31  ;;  %534 = vmatprep.mubr.f32.mxu0 %v1067_v4 }
 0x276   :  { %897 = vmatmul.mubr.msk.f32.vlgmr.msra.gmra.mrb[10].mxu0 %vm96_vm1, %v430_v48 }
 0x277   :  { %540 = vmatprep.mubr.f32.mxu0 %v1067_v4 }
 0x27a   :  { %898 = vmatmul.mubr.msk.f32.gmra.mrb[12].mxu0 %vm96_vm1, %v431_v49 }
 0x27b   :  { %546 = vmatprep.mubr.f32.mxu0 %v1067_v4 }
 0x27e   :  { %899 = vmatmul.mubr.msk.f32.gmra.mrb[14].mxu0 %vm96_vm1, %v432_v32  ;;  %v593_v32 = vpop.permute.xlu0 %592 }
 0x27f   :  { %552 = vmatprep.mubr.f32.mxu0 %v1067_v4 }
 0x282   :  { %900 = vmatmul.mubr.msk.f32.gmra.mrb[16].mxu0 %vm96_vm1, %v433_v50 }
 0x283   :  { %778 = vmatprep.mubr.f32.mxu0 %v1067_v4 }
 0x345   :  { %v425_v57 = vpop.f32.mrb[8].mxu0 }
 0x346   :  { %v1306_v58 = vadd.f32 %v425_v57, %v354_v56  ;;  %v427_v59 = vpop.f32.mrb[9].mxu0 }
 0x347   :  { %v1308_v60 = vadd.f32 %v427_v59, %v354_v56 }
 0x349   :  { %v790_v61 = vcombine.low %v1306_v58, %v1308_v60  ;;  %v536_v62 = vpop.f32.mrb[10].mxu0 }
 0x34a   :  { %v537_v63 = vadd.f32 %v536_v62, %v441_v51  ;;  %v538_v0 = vpop.f32.mrb[11].mxu0 }
 0x34b   :  { %v539_v1 = vadd.f32 %v538_v0, %v441_v51 }
 0x34c   :  { %978 = vtanh.f32 %v537_v63 }
 0x34d   :  { %v542_v3 = vpop.f32.mrb[12].mxu0  ;;  %980 = vtanh.f32 %v539_v1 }
 0x34e   :  { %v543_v5 = vadd.f32 %v542_v3, %v446_v2  ;;  %v544_v6 = vpop.f32.mrb[13].mxu0 }
 0x34f   :  { %v545_v7 = vadd.f32 %v544_v6, %v446_v2 }
 0x350   :  { %982 = vtanh.f32 %v543_v5 }
 0x351   :  { %984 = vtanh.f32 %v545_v7  ;;  %v548_v8 = vpop.f32.mrb[14].mxu0  ;;  %v704_v7 = vld [vmem:[%s1392_s12] sm:$0xf]  ;;  %s1070_s12 = smov [#allocation2]  }
 0x352   :  { %v549_v9 = vadd.f32 %v548_v8, %v451_v52  ;;  %v550_v10 = vpop.f32.mrb[15].mxu0  ;;  %s862_s2 = sshll.u32 %s1070_s12, 4  ;;  %s863_s2 = int_to_ptr.vmem [resolvable:$true] %s862_s2 }
 0x353   :  { %v551_v11 = vadd.f32 %v550_v10, %v451_v52  ;;  %s1018_s28 = scalar_lea.vmem %s863_s2, 128  ;;  %p1023_p1 = scmp.lt.s32.totalorder %s863_s2, %s863_s2 }
 0x354   :  { %986 = vtanh.f32 %v549_v9  ;;  %p1019_p0 = scmp.ne.s32.totalorder %s863_s2, %s1018_s28  ;;  %p1024_p2 = scmp.lt.s32.totalorder %s1018_s28, %s1018_s28 }
 0x355   :  { %v554_v13 = vpop.f32.mrb[16].mxu0  ;;  %988 = vtanh.f32 %v551_v11 }
 0x356   :  { %v555_v14 = vadd.f32 %v554_v13, %v456_v12  ;;  %v556_v15 = vpop.f32.mrb[17].mxu0  ;;  %v979_v17 = vpop.eup %978  ;;  %p1025_p3 = por %p1024_p2, %p1023_p1 }
 0x357   :  { %v557_v16 = vadd.f32 %v556_v15, %v456_v12  ;;  %v981_v18 = vpop.eup %980  ;;  %v796_v15 = vpop.permute.xlu0 %795 }
 0x358   :  { %990 = vtanh.f32 %v555_v14  ;;  %p1026_p4 = pnand %p1025_p3, %p1019_p0 }
 0x359   :  { %992 = vtanh.f32 %v557_v16 }
 0x35a   :  { %v983_v19 = vpop.eup %982 }
 0x35b   :  { %v985_v20 = vpop.eup %984  ;;  %v924_v21 = vpack.c.bf16 %v983_v19, %v979_v17 }
 0x35c   :  { %v922_v22 = vpack.c.bf16 %v985_v20, %v981_v18 }
 0x35e   :  { %923 = vmatprep.subr.bf16.mxu1 %v922_v22  ;;  %v987_v23 = vpop.eup %986 }
 0x35f   :  { %925 = vmatpush1.bf16.msra.mxu1 %v924_v21  ;;  %v989_v25 = vpop.eup %988 }
 0x362   :  { %v991_v27 = vpop.eup %990 }
 0x363   :  { %v993_v28 = vpop.eup %992  ;;  %v928_v30 = vpack.c.bf16 %v991_v27, %v987_v23 }
 0x364   :  { %v926_v33 = vpack.c.bf16 %v993_v28, %v989_v25 }
 0x366   :  { %927 = vmatprep.subr.bf16.mxu1 %v926_v33 }
 0x367   :  { %929 = vmatpush1.bf16.msra.mxu1 %v928_v30  ;;  %v1069_v30 = vmov 1966171168  }
 0x368   :  { %v837_v33 = vunpack.c.l.s4 %v1069_v30 }
 0x36a   :  { %901 = vmatmul.mubr.msk.f32.vlgmr.msra.gmra.mrb[8].mxu1 %vm239_vm2, %v567_v34 }
 0x36b   :  { %677 = vmatprep.mubr.f32.mxu1 %v1067_v4 }
 0x36e   :  { %902 = vmatmul.mubr.msk.f32.gmra.mrb[10].mxu1 %vm239_vm2, %v568_v35 }
 0x36f   :  { %683 = vmatprep.mubr.f32.mxu1 %v1067_v4 }
 0x372   :  { %903 = vmatmul.mubr.msk.f32.gmra.mrb[12].mxu1 %vm239_vm2, %v569_v36 }
 0x373   :  { %689 = vmatprep.mubr.f32.mxu1 %v1067_v4 }
 0x376   :  { %904 = vmatmul.mubr.msk.f32.gmra.mrb[14].mxu1 %vm239_vm2, %v570_v37 }
 0x43d   :  { %v673_v38 = vpop.f32.mrb[8].mxu1 }
 0x43e   :  { %v674_v39 = vadd.f32 %v673_v38, %v1300_v53  ;;  %v675_v40 = vpop.f32.mrb[9].mxu1 }
 0x43f   :  { %v676_v41 = vadd.f32 %v675_v40, %v1300_v53 }
 0x440   :  { %994 = vtanh.f32 %v674_v39  ;;  %v838_v39 = vunpack.c.0.s8 %v837_v33 }
 0x441   :  { %v679_v43 = vpop.f32.mrb[10].mxu1  ;;  %996 = vtanh.f32 %v676_v41 }
 0x442   :  { %v680_v44 = vadd.f32 %v679_v43, %v583_v42  ;;  %v681_v45 = vpop.f32.mrb[11].mxu1 }
 0x443   :  { %v682_v46 = vadd.f32 %v681_v45, %v583_v42 }
 0x444   :  { %998 = vtanh.f32 %v680_v44 }
 0x445   :  { %1000 = vtanh.f32 %v682_v46  ;;  %v685_v4 = vpop.f32.mrb[12].mxu1  ;;  %v841_v46 = vsub.s32 %v838_v39, %v1212_v26 }
 0x446   :  { %v686_v47 = vadd.f32 %v685_v4, %v1302_v54  ;;  %v687_v48 = vpop.f32.mrb[13].mxu1 }
 0x447   :  { %v688_v49 = vadd.f32 %v687_v48, %v1302_v54 }
 0x448   :  { %1002 = vtanh.f32 %v686_v47 }
 0x449   :  { %v691_v50 = vpop.f32.mrb[14].mxu1  ;;  %1004 = vtanh.f32 %v688_v49 }
 0x44a   :  { %v692_v51 = vadd.f32 %v691_v50, %v593_v32  ;;  %v693_v52 = vpop.f32.mrb[15].mxu1  ;;  %v995_v56 = vpop.eup %994 }
 0x44b   :  { %v694_v53 = vadd.f32 %v693_v52, %v593_v32  ;;  %v997_v57 = vpop.eup %996 }
 0x44c   :  { %1006 = vtanh.f32 %v692_v51 }
 0x44d   :  { %1008 = vtanh.f32 %v694_v53 }
 0x44e   :  { %v999_v59 = vpop.eup %998 }
 0x44f   :  { %v1001_v62 = vpop.eup %1000  ;;  %v932_v63 = vpack.c.bf16 %v999_v59, %v995_v56 }
 0x450   :  { %v930_v0 = vpack.c.bf16 %v1001_v62, %v997_v57 }
 0x452   :  { %931 = vmatprep.subr.bf16.mxu0 %v930_v0  ;;  %v1003_v1 = vpop.eup %1002 }
 0x453   :  { %933 = vmatpush1.bf16.msra.mxu0 %v932_v63  ;;  %v1005_v2 = vpop.eup %1004 }
 0x456   :  { %v1007_v54 = vpop.eup %1006 }
 0x457   :  { %v1009_v3 = vpop.eup %1008  ;;  %v936_v5 = vpack.c.bf16 %v1007_v54, %v1003_v1 }
 0x458   :  { %v934_v6 = vpack.c.bf16 %v1009_v3, %v1005_v2 }
 0x45a   :  { %935 = vmatprep.subr.bf16.mxu0 %v934_v6 }
 0x45b   :  { %937 = vmatpush1.bf16.msra.mxu0 %v936_v5 }
 0x45e   :  { %905 = vmatmul.mubr.msk.f32.vlgmr.msra.gmra.mrb[18].mxu0 %vm239_vm2, %v704_v7 }
 0x531   :  { %v780_v8 = vpop.f32.mrb[18].mxu0 }
 0x532   :  { %v781_v9 = vadd.f32 %v780_v8, %v1304_v55  ;;  %v782_v10 = vpop.f32.mrb[19].mxu0 }
 0x533   :  { %v783_v11 = vadd.f32 %v782_v10, %v1304_v55  ;;  %v792_v55 = vsub.f32 %v1218_v29, %v790_v61 }
 0x534   :  { %1010 = vtanh.f32 %v781_v9 }
 0x535   :  { %1012 = vtanh.f32 %v783_v11  ;;  %v799_v35 = vcombine.high %v792_v55, %v792_v55  ;;  %v801_v40 = vmul.f32 %v796_v15, %v792_v55 }
 0x537   :  { %v802_v43 = vmul.f32 %v799_v35, %v796_v15 }
 0x53e   :  { %v1011_v12 = vpop.eup %1010 }
 0x53f   :  { %v1013_v13 = vpop.eup %1012  ;;  %v803_v14 = vsub.f32 0.0, %v1011_v12 }
 0x540   :  { %v804_v16 = vsub.f32 0.0, %v1013_v13 }
 0x541   :  { %v805_v17 = vmul.f32 1.442695, %v803_v14  ;;  %v817_v18 = vmul.f32 %v803_v14, %v796_v15 }
 0x542   :  { %v807_v19 = vmul.f32 1.442695, %v804_v16  ;;  %v818_v20 = vmul.f32 %v804_v16, %v796_v15 }
 0x543   :  { %1014 = vpow2.f32 %v805_v17  ;;  %v819_v21 = vsel %vm109_vm0, %v817_v18, 0.0 }
 0x544   :  { %v820_v22 = vrot.slane %v819_v21, 4  ;;  %1016 = vpow2.f32 %v807_v19  ;;  %v826_v23 = vsel %vm109_vm0, %v818_v20, 0.0 }
 0x545   :  { %v827_v25 = vrot.slane %v826_v23, 4 }
 0x546   :  { %v821_v27 = vadd.f32 %v820_v22, %v819_v21 }
 0x547   :  { %v828_v28 = vadd.f32 %v827_v25, %v826_v23 }
 0x548   :  { %v822_v34 = vrot.slane %v821_v27, 2 }
 0x549   :  { %v829_v36 = vrot.slane %v828_v28, 2 }
 0x54a   :  { %v823_v37 = vadd.f32 %v822_v34, %v821_v27 }
 0x54b   :  { %v830_v38 = vadd.f32 %v829_v36, %v828_v28 }
 0x54c   :  { %v824_v41 = vrot.slane %v823_v37, 1 }
 0x54d   :  { %v1015_v42 = vpop.eup %1014  ;;  %v831_v44 = vrot.slane %v830_v38, 1 }
 0x54e   :  { %v1017_v45 = vpop.eup %1016  ;;  %v809_v58 = vmul.f32 %v1015_v42, %v801_v40  ;;  %v825_v60 = vadd.f32 %v824_v41, %v823_v37 }
 0x54f   :  { %v810_v29 = vmul.f32 %v1017_v45, %v802_v43  ;;  %v832_v61 = vadd.f32 %v831_v44, %v830_v38 }
 0x551   :  { %v813_v4 = vcombine.low %v809_v58, %v810_v29  ;;  %v835_v47 = vcombine.low %v825_v60, %v832_v61 }
 0x553   :  { %v815_v48 = vadd.f32 %v813_v4, %v1221_v31  ;;  %v842_v49 = vrot.slane %v835_v47, %v841_v46 }
 0x555   :  { %816 = vst [vmem:[#allocation2] sm:$0xff] %v815_v48  ;;  %v849_v50 = vrot.slane %v842_v49, %v841_v46 }
 0x556   :  { %1029 = shalt.err (!%p1026_p4)
}
 0x557   :  { %s1030_s3 = scalar_lea.hbm %s1394_s14, 128 }
 0x558   :  { %p1031_p5 = scmp.ne.s32.totalorder %s1394_s14, %s1030_s3  ;;  %p1034_p6 = scmp.lt.u32.totalorder %s1030_s3, %s1394_s14 }
 0x55a   :  { %p1036_p7 = pnand %p1034_p6, %p1031_p5 }
 0x55c   :  { %1039 = shalt.err (!%p1036_p7)
}
 0x55d   :  { %865 = dma.vmem_to_hbm [thread:$0]  %s863_s2, 128, %s1394_s14, [#allocation3]   ;;  %855 = vst.msk [vmem:[#allocation4] sm:$0x3] %vm1350_vm3, %v849_v50 }
 0x55e   :  { %s1040_s6 = scalar_lea.vmem %s873_s27, 32  ;;  %p1045_p9 = scmp.lt.s32.totalorder %s873_s27, %s873_s27 }
 0x55f   :  { %p1041_p8 = scmp.ne.s32.totalorder %s873_s27, %s1040_s6  ;;  %p1046_p10 = scmp.lt.s32.totalorder %s1040_s6, %s1040_s6 }
 0x561   :  { %p1047_p11 = por %p1046_p10, %p1045_p9 }
 0x563   :  { %p1048_p12 = pnand %p1047_p11, %p1041_p8 }
 0x565   :  { %1051 = shalt.err (!%p1048_p12)
}
 0x566   :  { %s1052_s9 = scalar_lea.hbm %s1395_s15, 32 }
 0x567   :  { %p1053_p13 = scmp.ne.s32.totalorder %s1395_s15, %s1052_s9  ;;  %p1056_p0 = scmp.lt.u32.totalorder %s1052_s9, %s1395_s15 }
 0x569   :  { %p1058_p1 = pnand %p1056_p0, %p1053_p13 }
 0x56b   :  { %1061 = shalt.err (!%p1058_p1)
}
 0x56c   :  { %875 = dma.vmem_to_hbm [thread:$0]  %s873_s27, 32, %s1395_s15, [#allocation5]  }
 0x56d   :  { %1062 = dma.done.wait [#allocation3], 128  }
 0x56e   :  { %1063 = vsyncadd [#allocation3], 4294967168 }
 0x56f   :  { %1064 = dma.done.wait [#allocation5], 32  }
 0x570   :  { %1065 = vsyncadd [#allocation5], 4294967264 }
 0x571   :  { %882 = vsyncpa [#allocation3], 1 }
 0x572   :  { %883 = vsyncpa [#allocation5], 1 }

</bundles_post_ra>
